<compile_context>
chip_gen: v5e
topology: v5e:2x2
jax: 0.10.0
libtpu: 0.0.40
codegen_flags: <defaults>
</compile_context>

<pallas_src>
import jax
import jax.numpy as jnp
from jax.experimental import pallas as pl
from jax.experimental.pallas import tpu as pltpu

STATE_SIZE = 9
NUM_ACTIONS = 7
CRITIC_H = 10
ACTOR_H = 20

PAD_IN = 16          # state lanes padded 9 -> 16 (not 128)
PAD_LANE = 128       # fused hidden width (layer-1 / layer-2 outputs)
OUT_LANES = 16       # merged output slab: probs lanes 0..6, value lane 8
PAD_SUB = 8          # batch padded to multiples of 8 sublanes
MAX_TILE_B = 2048    # batch tile cap for large rollout batches
SMALL_PALLAS_BATCH = 8   # B <= this -> plain jnp path in a2c_forward()

# Packed column layout:
#   layer-1 output : critic hidden in cols [0,10), actor hidden in cols [10,30)
#   layer-2 output : actor hidden in cols [0,20),  critic value in col VALUE_COL
#   merged output  : action probs in lanes [0,7),  value in lane VALUE_OUT_COL
VALUE_COL = ACTOR_H        # 20
VALUE_OUT_COL = 8
NEG_INF = -1e30


def _a2c_kernel(x_ref, w1_ref, w2_ref, w3_ref, b_ref, out_ref):
    x = x_ref[...]                              # (TB, 16) f32, zero-padded

    b1 = b_ref[0:1, :]                          # fused fc1 biases (critic | actor)
    b2 = b_ref[1:2, :]                          # fused fc2 biases (actor | value)
    b3 = b_ref[2:3, 0:OUT_LANES]                # actor fc3 bias, -1e30 on lanes >= 7

    # layer 1 (both heads, fused): ReLU applies to every real column
    h1 = jnp.dot(x, w1_ref[...], preferred_element_type=jnp.float32) + b1
    h1 = jnp.maximum(h1, 0.0)

    # layer 2 (both heads, fused, block-diagonal weights)
    h2p = jnp.dot(h1, w2_ref[...], preferred_element_type=jnp.float32) + b2
    lane128 = jax.lax.broadcasted_iota(jnp.int32, h2p.shape, 1)
    # ReLU only on the actor-hidden columns; the critic value column passes through
    h2 = jnp.where(lane128 < ACTOR_H, jnp.maximum(h2p, 0.0), h2p)
    value = h2[:, VALUE_COL:VALUE_COL + 1]      # (TB, 1)

    # layer 3 (actor logits, 16 lanes); padded-lane mask is baked into b3 (-1e30)
    logits = jnp.dot(h2, w3_ref[...], preferred_element_type=jnp.float32) + b3

    # softmax: padded lanes hold -1e30 -> exp underflows cleanly to 0.
    # Exact divide (kernel is memory-bound; approx reciprocal biased the probs).
    m = jnp.max(logits, axis=-1, keepdims=True)
    e = jnp.exp(logits - m)
    denom = jnp.sum(e, axis=-1, keepdims=True)
    probs = e / denom

    # merged 16-lane output: probs in lanes 0..6, value in lane VALUE_OUT_COL
    lane16 = jax.lax.broadcasted_iota(jnp.int32, probs.shape, 1)
    out_ref[...] = jnp.where(lane16 == VALUE_OUT_COL, value, probs)


def pack_params(params):
    """Pad/pack raw parameters into 3 fused weights + 1 bias tile.

    Run ONCE per parameter update; the result is reused by every forward call.
    """
    f32 = jnp.float32

    w1 = jnp.zeros((PAD_IN, PAD_LANE), f32)
    w1 = w1.at[:STATE_SIZE, :CRITIC_H].set(params["cw1"].astype(f32))
    w1 = w1.at[:STATE_SIZE, CRITIC_H:CRITIC_H + ACTOR_H].set(params["aw1"].astype(f32))

    w2 = jnp.zeros((PAD_LANE, PAD_LANE), f32)
    # critic fc2: critic hidden (rows 0..9) -> value column
    w2 = w2.at[:CRITIC_H, VALUE_COL:VALUE_COL + 1].set(params["cw2"].astype(f32))
    # actor fc2: actor hidden (rows 10..29) -> cols 0..19
    w2 = w2.at[CRITIC_H:CRITIC_H + ACTOR_H, :ACTOR_H].set(params["aw2"].astype(f32))

    w3 = jnp.zeros((PAD_LANE, OUT_LANES), f32)
    w3 = w3.at[:ACTOR_H, :NUM_ACTIONS].set(params["aw3"].astype(f32))

    b = jnp.zeros((PAD_SUB, PAD_LANE), f32)
    b = b.at[0, :CRITIC_H].set(params["cb1"].astype(f32))
    b = b.at[0, CRITIC_H:CRITIC_H + ACTOR_H].set(params["ab1"].astype(f32))
    b = b.at[1, :ACTOR_H].set(params["ab2"].astype(f32))
    b = b.at[1, VALUE_COL].set(params["cb2"].astype(f32)[0])
    # fc3 bias with the action mask baked in: -1e30 on padded action lanes
    b = b.at[2, :OUT_LANES].set(NEG_INF)
    b = b.at[2, :NUM_ACTIONS].set(params["ab3"].astype(f32))

    raw = {k: jnp.asarray(v, f32) for k, v in params.items()}
    return dict(W1=w1, W2=w2, W3=w3, B=b, raw=raw)


def _tile_config(batch):
    """Pick (tile_b, padded_batch). >=2 tiles when there is >1 sublane-tile of
    work so the 'parallel' grid axis can shard across both v7x TensorCores."""
    bp8 = max(PAD_SUB, -(-batch // PAD_SUB) * PAD_SUB)
    if bp8 <= PAD_SUB:
        tile_b = bp8
    else:
        half = -(-bp8 // (2 * PAD_SUB)) * PAD_SUB      # ceil(bp8/2), 8-aligned
        tile_b = min(half, MAX_TILE_B)
    bp = -(-bp8 // tile_b) * tile_b
    return tile_b, bp


@jax.jit
def _a2c_forward_impl(state, w1, w2, w3, bias):
    batch = state.shape[0]
    tile_b, bp = _tile_config(batch)

    # pad only to 16 lanes / 8-row multiple (was 128 lanes -> 28x wasted bytes)
    x_p = jnp.zeros((bp, PAD_IN), jnp.float32)
    x_p = x_p.at[:batch, :STATE_SIZE].set(state.astype(jnp.float32))

    out = pl.pallas_call(
        _a2c_kernel,
        out_shape=jax.ShapeDtypeStruct((bp, OUT_LANES), jnp.float32),
        grid=(bp // tile_b,),
        in_specs=[
            pl.BlockSpec((tile_b, PAD_IN), lambda i: (i, 0)),      # x
            pl.BlockSpec((PAD_IN, PAD_LANE), lambda i: (0, 0)),    # W1 (resident)
            pl.BlockSpec((PAD_LANE, PAD_LANE), lambda i: (0, 0)),  # W2 (resident)
            pl.BlockSpec((PAD_LANE, OUT_LANES), lambda i: (0, 0)), # W3 (resident)
            pl.BlockSpec((PAD_SUB, PAD_LANE), lambda i: (0, 0)),   # packed biases
        ],
        out_specs=pl.BlockSpec((tile_b, OUT_LANES), lambda i: (i, 0)),
        compiler_params=pltpu.CompilerParams(
            dimension_semantics=("parallel",)),
    )(x_p, w1, w2, w3, bias)

    action_probs = out[:batch, :NUM_ACTIONS]
    value = out[:batch, VALUE_OUT_COL:VALUE_OUT_COL + 1]
    return action_probs, value


def a2c_forward_pallas(state, packed):
    """Always run the fused Pallas kernel.

    state: (B, STATE_SIZE) f32, packed: output of pack_params.
    Returns (action_probs (B, 7), value (B, 1))."""
    return _a2c_forward_impl(state, packed["W1"], packed["W2"], packed["W3"],
                             packed["B"])


def _reference_forward(state, p):
    """Pure-JAX reference (HIGHEST matmul precision for a trustworthy baseline)."""
    hi = jax.lax.Precision.HIGHEST
    h = jnp.maximum(jnp.dot(state, p["cw1"], precision=hi) + p["cb1"], 0.0)
    value = jnp.dot(h, p["cw2"], precision=hi) + p["cb2"]
    a = jnp.maximum(jnp.dot(state, p["aw1"], precision=hi) + p["ab1"], 0.0)
    a = jnp.maximum(jnp.dot(a, p["aw2"], precision=hi) + p["ab2"], 0.0)
    logits = jnp.dot(a, p["aw3"], precision=hi) + p["ab3"]
    probs = jax.nn.softmax(logits, axis=-1)
    return probs, value


_small_forward = jax.jit(_reference_forward)


def a2c_forward(state, packed):
    """Dispatching forward: tiny acting batches (B <= 8) use the plain jnp path
    (kernel launch + pad/slice round-trips can only lose at ~1.6 KFLOP); rollout
    / eval batches go through the Pallas kernel."""
    if state.shape[0] <= SMALL_PALLAS_BATCH:
        return _small_forward(state, packed["raw"])
    return a2c_forward_pallas(state, packed)


def init_params(key):
    """Deterministic init mimicking nn.Linear's U(-1/sqrt(fan_in), 1/sqrt(fan_in))."""
    def linear(k, fan_in, fan_out):
        kw, kb = jax.random.split(k)
        bound = 1.0 / jnp.sqrt(jnp.float32(fan_in))
        w = jax.random.uniform(kw, (fan_in, fan_out), jnp.float32, -bound, bound)
        b = jax.random.uniform(kb, (fan_out,), jnp.float32, -bound, bound)
        return w, b

    keys = jax.random.split(key, 5)
    cw1, cb1 = linear(keys[0], STATE_SIZE, CRITIC_H)
    cw2, cb2 = linear(keys[1], CRITIC_H, 1)
    aw1, ab1 = linear(keys[2], STATE_SIZE, ACTOR_H)
    aw2, ab2 = linear(keys[3], ACTOR_H, ACTOR_H)
    aw3, ab3 = linear(keys[4], ACTOR_H, NUM_ACTIONS)
    return dict(cw1=cw1, cb1=cb1, cw2=cw2, cb2=cb2,
                aw1=aw1, ab1=ab1, aw2=aw2, ab2=ab2, aw3=aw3, ab3=ab3)


# TODO(synk): game env (SCLGame/FPGAGame), Normalizer state updates, Adam
# optimizers and the training loop are host-side control flow, not kernel work.

if __name__ == "__main__":
    key = jax.random.PRNGKey(0)
    k_param, k_s1, k_s2 = jax.random.split(key, 3)

    params = init_params(k_param)
    packed = pack_params(params)              # packed once, reused every step
    packed = jax.tree_util.tree_map(jax.block_until_ready, packed)

    # ---- small acting batch, forced through the Pallas kernel ----
    batch = 2
    state = jax.random.normal(k_s1, (batch, STATE_SIZE), jnp.float32)
    action_probs, value = a2c_forward_pallas(state, packed)
    jax.block_until_ready(action_probs)
    jax.block_until_ready(value)

    ref_probs, ref_value = _reference_forward(state, params)
    assert action_probs.shape == (batch, NUM_ACTIONS)
    assert value.shape == (batch, 1)
    assert jnp.allclose(action_probs, ref_probs, atol=1e-4, rtol=1e-4)
    assert jnp.allclose(value, ref_value, atol=1e-4, rtol=1e-4)
    assert jnp.allclose(jnp.sum(action_probs, axis=-1), 1.0, atol=1e-5)

    # ---- rollout-sized batch through the dispatcher (multi-tile grid) ----
    batch_big = 64
    state_big = jax.random.normal(k_s2, (batch_big, STATE_SIZE), jnp.float32)
    probs_big, value_big = a2c_forward(state_big, packed)
    jax.block_until_ready(probs_big)
    jax.block_until_ready(value_big)

    ref_probs_big, ref_value_big = _reference_forward(state_big, params)
    assert probs_big.shape == (batch_big, NUM_ACTIONS)
    assert value_big.shape == (batch_big, 1)
    assert jnp.allclose(probs_big, ref_probs_big, atol=1e-4, rtol=1e-4)
    assert jnp.allclose(value_big, ref_value_big, atol=1e-4, rtol=1e-4)

    print("KERNEL_OK")
</pallas_src>

<mosaic_0001>
module attributes {stable_mosaic.version = 11 : i64} {
  func.func @_a2c_kernel(%arg0: i32, %arg1: memref<8x16xf32, #tpu.memory_space<vmem>>, %arg2: memref<16x128xf32, #tpu.memory_space<vmem>>, %arg3: memref<128x128xf32, #tpu.memory_space<vmem>>, %arg4: memref<128x16xf32, #tpu.memory_space<vmem>>, %arg5: memref<8x128xf32, #tpu.memory_space<vmem>>, %arg6: memref<8x16xf32, #tpu.memory_space<vmem>>) attributes {dimension_semantics = [#tpu.dimension_semantics<parallel>], iteration_bounds = array<i64: 1>, scalar_prefetch = 0 : i64, scratch_operands = 0 : i64, tpu.core_type = #tpu.core_type<tc>, window_params = [{transform_indices = @transform_0, window_bounds = array<i64: 8, 16>}, {pipeline_mode = #tpu.pipeline_mode<synchronous>, transform_indices = @transform_1, window_bounds = array<i64: 16, 128>}, {pipeline_mode = #tpu.pipeline_mode<synchronous>, transform_indices = @transform_2, window_bounds = array<i64: 128, 128>}, {pipeline_mode = #tpu.pipeline_mode<synchronous>, transform_indices = @transform_3, window_bounds = array<i64: 128, 16>}, {pipeline_mode = #tpu.pipeline_mode<synchronous>, transform_indices = @transform_4, window_bounds = array<i64: 8, 128>}, {transform_indices = @transform_5, window_bounds = array<i64: 8, 16>}]} {
    %c0 = arith.constant 0 : index
    %c0_0 = arith.constant 0 : index
    %0 = vector.load %arg1[%c0, %c0_0] : memref<8x16xf32, #tpu.memory_space<vmem>>, vector<8x16xf32>
    %c0_1 = arith.constant 0 : index
    %c0_2 = arith.constant 0 : index
    %1 = vector.load %arg5[%c0_1, %c0_2] : memref<8x128xf32, #tpu.memory_space<vmem>>, vector<1x128xf32>
    %c1 = arith.constant 1 : index
    %c0_3 = arith.constant 0 : index
    %2 = vector.load %arg5[%c1, %c0_3] : memref<8x128xf32, #tpu.memory_space<vmem>>, vector<1x128xf32>
    %c2 = arith.constant 2 : index
    %c0_4 = arith.constant 0 : index
    %3 = vector.load %arg5[%c2, %c0_4] : memref<8x128xf32, #tpu.memory_space<vmem>>, vector<1x16xf32>
    %c0_5 = arith.constant 0 : index
    %c0_6 = arith.constant 0 : index
    %4 = vector.load %arg2[%c0_5, %c0_6] : memref<16x128xf32, #tpu.memory_space<vmem>>, vector<16x128xf32>
    %cst = arith.constant dense<0.000000e+00> : vector<8x128xf32>
    %5 = tpu.matmul %0, %4, %cst {dimension_numbers = #tpu.dot_dimension_numbers<[1], [0], [0], [1], [0, 0, 1, 1], [], []>} : vector<8x16xf32>, vector<16x128xf32>, vector<8x128xf32> -> vector<8x128xf32>
    %6 = vector.broadcast %1 : vector<1x128xf32> to vector<8x128xf32>
    %7 = arith.addf %5, %6 : vector<8x128xf32>
    %cst_7 = arith.constant 0.000000e+00 : f32
    %8 = vector.broadcast %cst_7 : f32 to vector<8x128xf32>
    %9 = arith.maximumf %7, %8 : vector<8x128xf32>
    %c0_8 = arith.constant 0 : index
    %c0_9 = arith.constant 0 : index
    %10 = vector.load %arg3[%c0_8, %c0_9] : memref<128x128xf32, #tpu.memory_space<vmem>>, vector<128x128xf32>
    %cst_10 = arith.constant dense<0.000000e+00> : vector<8x128xf32>
    %11 = tpu.matmul %9, %10, %cst_10 {dimension_numbers = #tpu.dot_dimension_numbers<[1], [0], [0], [1], [0, 0, 1, 1], [], []>} : vector<8x128xf32>, vector<128x128xf32>, vector<8x128xf32> -> vector<8x128xf32>
    %12 = vector.broadcast %2 : vector<1x128xf32> to vector<8x128xf32>
    %13 = arith.addf %11, %12 : vector<8x128xf32>
    %14 = tpu.iota {dimensions = array<i32: 1>} : vector<8x128xi32>
    %c20_i32 = arith.constant 20 : i32
    %15 = vector.broadcast %c20_i32 : i32 to vector<8x128xi32>
    %16 = arith.cmpi slt, %14, %15 : vector<8x128xi32>
    %cst_11 = arith.constant 0.000000e+00 : f32
    %17 = vector.broadcast %cst_11 : f32 to vector<8x128xf32>
    %18 = arith.maximumf %13, %17 : vector<8x128xf32>
    %19 = arith.select %16, %18, %13 : vector<8x128xi1>, vector<8x128xf32>
    %20 = vector.extract_strided_slice %19 {offsets = [0, 20], sizes = [8, 1], strides = [1, 1]} : vector<8x128xf32> to vector<8x1xf32>
    %c0_12 = arith.constant 0 : index
    %c0_13 = arith.constant 0 : index
    %21 = vector.load %arg4[%c0_12, %c0_13] : memref<128x16xf32, #tpu.memory_space<vmem>>, vector<128x16xf32>
    %cst_14 = arith.constant dense<0.000000e+00> : vector<8x16xf32>
    %22 = tpu.matmul %19, %21, %cst_14 {dimension_numbers = #tpu.dot_dimension_numbers<[1], [0], [0], [1], [0, 0, 1, 1], [], []>} : vector<8x128xf32>, vector<128x16xf32>, vector<8x16xf32> -> vector<8x16xf32>
    %23 = vector.broadcast %3 : vector<1x16xf32> to vector<8x16xf32>
    %24 = arith.addf %22, %23 : vector<8x16xf32>
    %cst_15 = arith.constant dense<0xFF800000> : vector<8xf32>
    %25 = vector.multi_reduction <maximumf>, %24, %cst_15 [1] : vector<8x16xf32> to vector<8xf32>
    %26 = vector.shape_cast %25 : vector<8xf32> to vector<8x1xf32>
    %27 = vector.broadcast %26 : vector<8x1xf32> to vector<8x16xf32>
    %28 = arith.subf %24, %27 : vector<8x16xf32>
    %29 = math.exp %28 : vector<8x16xf32>
    %cst_16 = arith.constant dense<0.000000e+00> : vector<8xf32>
    %30 = vector.multi_reduction <add>, %29, %cst_16 [1] : vector<8x16xf32> to vector<8xf32>
    %31 = vector.shape_cast %30 : vector<8xf32> to vector<8x1xf32>
    %32 = vector.broadcast %31 : vector<8x1xf32> to vector<8x16xf32>
    %33 = arith.divf %29, %32 : vector<8x16xf32>
    %34 = tpu.iota {dimensions = array<i32: 1>} : vector<8x16xi32>
    %c8_i32 = arith.constant 8 : i32
    %35 = vector.broadcast %c8_i32 : i32 to vector<8x16xi32>
    %36 = arith.cmpi eq, %34, %35 : vector<8x16xi32>
    %37 = vector.shape_cast %20 : vector<8x1xf32> to vector<8x1xf32>
    %38 = vector.broadcast %37 : vector<8x1xf32> to vector<8x16xf32>
    %39 = arith.select %36, %38, %33 : vector<8x16xi1>, vector<8x16xf32>
    %c0_17 = arith.constant 0 : index
    %c0_18 = arith.constant 0 : index
    %40 = vector.load %arg6[%c0_17, %c0_18] : memref<8x16xf32, #tpu.memory_space<vmem>>, vector<8x16xf32>
    tpu.vector_store %arg6[%c0_17, %c0_18], %39 {strides = array<i32>} : memref<8x16xf32, #tpu.memory_space<vmem>>, vector<8x16xf32>,
    return
  }
  func.func @transform_0(%arg0: i32) -> (i32, i32) {
    %c0_i32 = arith.constant 0 : i32
    %c0_i32_0 = arith.constant 0 : i32
    return %arg0, %c0_i32 : i32, i32
  }
  func.func @transform_1(%arg0: i32) -> (i32, i32) {
    %c0_i32 = arith.constant 0 : i32
    %c0_i32_0 = arith.constant 0 : i32
    %c0_i32_1 = arith.constant 0 : i32
    return %c0_i32, %c0_i32_0 : i32, i32
  }
  func.func @transform_2(%arg0: i32) -> (i32, i32) {
    %c0_i32 = arith.constant 0 : i32
    %c0_i32_0 = arith.constant 0 : i32
    %c0_i32_1 = arith.constant 0 : i32
    return %c0_i32, %c0_i32_0 : i32, i32
  }
  func.func @transform_3(%arg0: i32) -> (i32, i32) {
    %c0_i32 = arith.constant 0 : i32
    %c0_i32_0 = arith.constant 0 : i32
    %c0_i32_1 = arith.constant 0 : i32
    return %c0_i32, %c0_i32_0 : i32, i32
  }
  func.func @transform_4(%arg0: i32) -> (i32, i32) {
    %c0_i32 = arith.constant 0 : i32
    %c0_i32_0 = arith.constant 0 : i32
    %c0_i32_1 = arith.constant 0 : i32
    return %c0_i32, %c0_i32_0 : i32, i32
  }
  func.func @transform_5(%arg0: i32) -> (i32, i32) {
    %c0_i32 = arith.constant 0 : i32
    %c0_i32_0 = arith.constant 0 : i32
    return %arg0, %c0_i32 : i32, i32
  }
}

</mosaic_0001>

<bundles_post_ra>
// kernel: _a2c_forward_impl.1
= control target key start
LH: loop header
LB: loop body
LE: loop exit
PB: predicated region body
PF: predicated region fallthrough
CT: control target
= control target key end

     0   :  { %vm27_vm0 = vcmask 130048   ;;  %v178_v39 = vmov 20   ;;  %v89_v40 = vlaneseq  ;;  %s330_s1 = inlined_call_operand.vmem [shape: f32[16,128], index: 1, kind: input, shape index: {}]   ;;  %s331_s0 = inlined_call_operand.vmem [shape: f32[8,16], index: 0, kind: input, shape index: {}]   ;;  %s332_s2 = inlined_call_operand.vmem [shape: f32[128,128], index: 2, kind: input, shape index: {}]   ;;  %s333_s4 = inlined_call_operand.vmem [shape: f32[8,128], index: 4, kind: input, shape index: {}]   ;;  %s334_s3 = inlined_call_operand.vmem [shape: f32[128,16], index: 3, kind: input, shape index: {}]   ;;  %s335_s5 = inlined_call_operand.vmem [shape: f32[8,16], index: 5, kind: output, shape index: {}]  }
   0x1   :  { %v25_v0 = vld [vmem:[%s330_s1 + $0x8] sm:$0xff]  ;;  %v24_v1 = vld [vmem:[%s330_s1] sm:$0xff]  ;;  %v67_v3 = vld [vmem:[%s332_s2 + $0x78] sm:$0xff]  ;;  %169 = vset.pattern.permute.xlu1 %v178_v39  ;;  %170 = vset.pattern.permute.xlu0 %v178_v39 }
   0x2   :  { %45 = vmatpush.msra.mxu0 %v25_v0  ;;  %v20_v2 = vld [vmem:[%s331_s0] sm:$0xff]  ;;  %v66_v4 = vld [vmem:[%s332_s2 + $0x70] sm:$0xff]  ;;  %69 = vmatpush.msra.mxu1 %v67_v3  ;;  %v65_v5 = vld [vmem:[%s332_s2 + $0x68] sm:$0xff]  ;;  %v90_v42 = vand.u32 127, %v89_v40 }
   0x3   :  { %v64_v6 = vld [vmem:[%s332_s2 + $0x60] sm:$0xff]  ;;  %v63_v7 = vld [vmem:[%s332_s2 + $0x58] sm:$0xff]  ;;  %v62_v8 = vld [vmem:[%s332_s2 + $0x50] sm:$0xff] }
   0x4   :  { %46 = vmatpush.msra.mxu0 %v24_v1  ;;  %70 = vmatpush.msra.mxu1 %v66_v4  ;;  %v61_v9 = vld [vmem:[%s332_s2 + $0x48] sm:$0xff]  ;;  %v60_v10 = vld [vmem:[%s332_s2 + $0x40] sm:$0xff]  ;;  %v59_v11 = vld [vmem:[%s332_s2 + $0x38] sm:$0xff]  ;;  %vm91_vm1 = vcmp.lt.s32.totalorder %v90_v42, 20  ;;  %vm155_vm6 = vcmp.eq.s32.totalorder %v90_v42, 8 }
   0x5   :  { %167 = vmatmul.msk.f32.vlgmr.msra.gmra.mxu0 %vm27_vm0, %v20_v2  ;;  %v58_v12 = vld [vmem:[%s332_s2 + $0x30] sm:$0xff]  ;;  %v57_v13 = vld [vmem:[%s332_s2 + $0x28] sm:$0xff]  ;;  %v56_v14 = vld [vmem:[%s332_s2 + $0x20] sm:$0xff] }
   0x6   :  { %71 = vmatpush.msra.mxu1 %v65_v5  ;;  %v55_v15 = vld [vmem:[%s332_s2 + $0x18] sm:$0xff]  ;;  %v54_v16 = vld [vmem:[%s332_s2 + $0x10] sm:$0xff]  ;;  %v53_v17 = vld [vmem:[%s332_s2 + $0x8] sm:$0xff] }
   0x7   :  { %v52_v18 = vld [vmem:[%s332_s2] sm:$0xff]  ;;  %v109_v19 = vld [vmem:[%s334_s3 + $0x78] sm:$0xff]  ;;  %v108_v20 = vld [vmem:[%s334_s3 + $0x70] sm:$0xff] }
   0x8   :  { %72 = vmatpush.msra.mxu1 %v64_v6  ;;  %111 = vmatpush.msra.mxu2 %v109_v19  ;;  %v107_v21 = vld [vmem:[%s334_s3 + $0x68] sm:$0xff]  ;;  %v106_v22 = vld [vmem:[%s334_s3 + $0x60] sm:$0xff]  ;;  %v105_v23 = vld [vmem:[%s334_s3 + $0x58] sm:$0xff] }
   0x9   :  { %v104_v24 = vld [vmem:[%s334_s3 + $0x50] sm:$0xff]  ;;  %v103_v25 = vld [vmem:[%s334_s3 + $0x48] sm:$0xff]  ;;  %v102_v26 = vld [vmem:[%s334_s3 + $0x40] sm:$0xff] }
   0xa   :  { %73 = vmatpush.msra.mxu1 %v63_v7  ;;  %112 = vmatpush.msra.mxu2 %v108_v20  ;;  %v101_v27 = vld [vmem:[%s334_s3 + $0x38] sm:$0xff]  ;;  %v100_v28 = vld [vmem:[%s334_s3 + $0x30] sm:$0xff]  ;;  %v99_v29 = vld [vmem:[%s334_s3 + $0x28] sm:$0xff] }
   0xb   :  { %v98_v30 = vld [vmem:[%s334_s3 + $0x20] sm:$0xff]  ;;  %v97_v31 = vld [vmem:[%s334_s3 + $0x18] sm:$0xff]  ;;  %v96_v36 = vld [vmem:[%s334_s3 + $0x10] sm:$0xff] }
   0xc   :  { %74 = vmatpush.msra.mxu1 %v62_v8  ;;  %113 = vmatpush.msra.mxu2 %v107_v21  ;;  %v171_v32 = vld [vmem:[%s333_s4] ss:$0 sm:$0xff]  ;;  %v95_v37 = vld [vmem:[%s334_s3 + $0x8] sm:$0xff]  ;;  %v172_v41 = vld [vmem:[%s333_s4 + $0x1] ss:$0 sm:$0xff] }
   0xd   :  { %v94_v38 = vld [vmem:[%s334_s3] sm:$0xff] }
   0xe   :  { %75 = vmatpush.msra.mxu1 %v61_v9  ;;  %114 = vmatpush.msra.mxu2 %v106_v22  ;;  %v173_v47 = vld [vmem:[%s333_s4 + $0x2] ss:$0 sm:$0xff] }
  0x10   :  { %76 = vmatpush.msra.mxu1 %v60_v10  ;;  %115 = vmatpush.msra.mxu2 %v105_v23 }
  0x12   :  { %77 = vmatpush.msra.mxu1 %v59_v11  ;;  %116 = vmatpush.msra.mxu2 %v104_v24 }
  0x14   :  { %78 = vmatpush.msra.mxu1 %v58_v12  ;;  %117 = vmatpush.msra.mxu2 %v103_v25 }
  0x16   :  { %79 = vmatpush.msra.mxu1 %v57_v13  ;;  %118 = vmatpush.msra.mxu2 %v102_v26 }
  0x18   :  { %80 = vmatpush.msra.mxu1 %v56_v14  ;;  %119 = vmatpush.msra.mxu2 %v101_v27 }
  0x1a   :  { %81 = vmatpush.msra.mxu1 %v55_v15  ;;  %120 = vmatpush.msra.mxu2 %v100_v28 }
  0x1c   :  { %82 = vmatpush.msra.mxu1 %v54_v16  ;;  %121 = vmatpush.msra.mxu2 %v99_v29 }
  0x1e   :  { %83 = vmatpush.msra.mxu1 %v53_v17  ;;  %122 = vmatpush.msra.mxu2 %v98_v30 }
  0x20   :  { %84 = vmatpush.msra.mxu1 %v52_v18  ;;  %123 = vmatpush.msra.mxu2 %v97_v31 }
  0x22   :  { %124 = vmatpush.msra.mxu2 %v96_v36 }
  0x24   :  { %125 = vmatpush.msra.mxu2 %v95_v37 }
  0x26   :  { %126 = vmatpush.msra.mxu2 %v94_v38 }
  0x82   :  { %v48_v33 = vpop.f32.mrf.mxu0 }
  0x83   :  { %v49_v34 = vadd.f32 %v171_v32, %v48_v33 }
  0x85   :  { %v51_v35 = vmax.f32 %v49_v34, 0.0 }
  0x87   :  { %85 = vmatmul.f32.vlgmr.msra.gmra.mxu1 %v51_v35 }
 0x104   :  { %v86_v43 = vpop.f32.mrf.mxu1 }
 0x105   :  { %v87_v44 = vadd.f32 %v172_v41, %v86_v43 }
 0x107   :  { %v92_v45 = vmax.f32 %v87_v44, 0.0 }
 0x109   :  { %v93_v46 = vsel %vm91_vm1, %v92_v45, %v87_v44 }
 0x10a   :  { %158 = vperm.xlu1 %169, %v93_v46   ;;  %127 = vmatmul.f32.vlgmr.msra.gmra.mxu2 %v93_v46 }
 0x17c   :  { %v159_v4 = vpop.permute.xlu1 %158 }
 0x18d   :  { %v128_v48 = vpop.f32.mrf.mxu2 }
 0x18e   :  { %v129_v49 = vadd.f32 %v173_v47, %v128_v48 }
 0x190   :  { %v131_v50 = vsel %vm27_vm0, %v129_v49, -inf }
 0x191   :  { %132 = vmax.xlane.f32.xlu0 %v131_v50 }
 0x204   :  { %v133_v51 = vpop.xlane.xlu0 %132 }
 0x205   :  { %v134_v52 = vsub.f32 %v129_v49, %v133_v51 }
 0x207   :  { %v135_v53 = vmul.f32 1.442695, %v134_v52 }
 0x209   :  { %174 = vpow2.f32 %v135_v53 }
 0x20f   :  { %v175_v54 = vpop.eup %174 }
 0x210   :  { %v137_v55 = vsel %vm27_vm0, %v175_v54, 0.0 }
 0x211   :  { %138 = vadd.xlane.f32.xlu0 %v137_v55 }
 0x284   :  { %v139_v56 = vpop.xlane.xlu0 %138 }
 0x285   :  { %176 = vrcp.f32 %v139_v56  ;;  %v151_v60 = vand.u32 2147483648, %v139_v56  ;;  %v149_v62 = vand.u32 2147483647, %v139_v56  ;;  %vm145_vm3 = vweird.f32 %v139_v56 }
 0x287   :  { %v152_v0 = vor.u32 1.1754944e-38, %v151_v60  ;;  %vm150_vm5 = vcmp.eq.f32.partialorder %v149_v62, 8.507059e+37 }
 0x28b   :  { %v177_v57 = vpop.eup %176 }
 0x28c   :  { %v141_v58 = vmul.f32 %v177_v57, %v139_v56  ;;  %vm146_vm2 = vweird.f32 %v177_v57 }
 0x28d   :  { %vm147_vm4 = vmor %vm145_vm3, %vm146_vm2 }
 0x28e   :  { %v142_v59 = vsub.f32 1.0, %v141_v58 }
 0x290   :  { %v143_v61 = vmul.f32 %v177_v57, %v142_v59 }
 0x292   :  { %v144_v63 = vadd.f32 %v177_v57, %v143_v61 }
 0x294   :  { %v148_v1 = vsel %vm147_vm4, %v177_v57, %v144_v63 }
 0x295   :  { %v153_v2 = vsel %vm150_vm5, %v152_v0, %v148_v1 }
 0x296   :  { %v154_v3 = vmul.f32 %v175_v54, %v153_v2 }
 0x298   :  { %v161_v5 = vsel %vm155_vm6, %v159_v4, %v154_v3 }
 0x299   :  { %162 = vst.msk [vmem:[%s335_s5] sm:$0xff] %vm27_vm0, %v161_v5 }

</bundles_post_ra>
